<compile_context>
chip_gen: v5e
topology: v5e:2x2
jax: 0.10.0
libtpu: 0.0.40
codegen_flags: <defaults>
</compile_context>

<pallas_src>
import jax
import jax.numpy as jnp
import numpy as np
from jax.experimental import pallas as pl
from jax.experimental.pallas import tpu as pltpu


# ----------------------------- configuration -----------------------------
CAT_COLS = ["c0", "c1", "c2"]
CAT_UNIQUE = {"c0": 10, "c1": 6, "c2": 20}
CAT_EMB_DIM = 16
NUM_DIM = 32
FEATURE_DIM = 64

B, L = 2, 8

SUBLANE = 8
MAX_TM = 2048            # rows per grid step (sweepable; working set ~few MB at 2048)
MEGACORE_MIN_ROWS = 1024 # split rows across 2 TCs (v7x) only when there is real work


def _emb_dims():
    dims = []
    for c in CAT_COLS:
        u = CAT_UNIQUE[c]
        d = min(CAT_EMB_DIM, u // 2 + 1)
        d = max(d, 4)
        dims.append(d)
    return dims


def _round_up(x, m):
    return ((x + m - 1) // m) * m


# ------------------------------- the kernel -------------------------------
def make_kernel(cat_len, offsets, vocab_ext):
    """vocab_ext = sum(uniques) + 1; the last lane / table row is the fused bias."""
    offsets = tuple(float(o) for o in offsets)
    bias_lane = float(vocab_ext - 1)

    def kernel(xc_ref, xn_ref, wcat_ref, wnum_ref, out_ref):
        xc = xc_ref[...]   # (tm, cat_len) float32 index columns
        xn = xn_ref[...]   # (tm, num_dim) float32

        # One shared iota over the stacked vocabulary plus a trailing bias lane.
        iota = jax.lax.broadcasted_iota(jnp.int32, (1, vocab_ext), 1).astype(jnp.float32)

        # Multi-hot: per-column value + static offset compared against the shared iota
        # (float compares are exact for these small integers); bias lane is always hot.
        # TODO(synk): PyTorch's .long() truncates non-integer values; float equality drops
        # them (all-zero row) instead — identical for valid in-range integer inputs.
        mh = (iota == bias_lane).astype(jnp.float32)                # (1, V+1) const, broadcasts
        mh = mh + (xc[:, 0:1] + offsets[0] == iota).astype(jnp.float32)
        for i in range(1, cat_len):
            mh = mh + (xc[:, i:i + 1] + offsets[i] == iota).astype(jnp.float32)

        # Exactly two MXU matmuls (bias is the last row of wcat).
        acc = jnp.dot(mh, wcat_ref[...], preferred_element_type=jnp.float32)
        acc = acc + jnp.dot(xn, wnum_ref[...], preferred_element_type=jnp.float32)
        out_ref[...] = acc.astype(out_ref.dtype)

    return kernel


# ---------------------- one-time algebraic pre-fusion ----------------------
def fuse_params(params):
    """Compute fused tables ONCE at parameter-load time (exact: all maps are linear).

    Returns:
      w_cat_ext: (vocab_total + 1, F)  — rows = emb_i @ W_out chunks, last row = fused bias
      w_num    : (num_dim, F)          — w_num^T @ W_out_num^T
    """
    emb_dims = _emb_dims()
    w_out_t = params["w_out"].T                       # (cat_out + num_dim, F)
    rows, off = [], 0
    for i, d in enumerate(emb_dims):
        rows.append(params["emb"][i] @ w_out_t[off:off + d, :])     # (U_i, F)
        off += d
    w_out_num_t = w_out_t[off:, :]                    # (num_dim, F)
    b_fused = params["b_out"] + params["b_num"] @ w_out_num_t       # (F,)
    w_cat_ext = jnp.concatenate(rows + [b_fused[None, :]], axis=0)  # (vocab_total+1, F)
    w_num_fused = params["w_num"].T @ w_out_num_t                   # (num_dim, F)
    return {"w_cat_ext": w_cat_ext, "w_num": w_num_fused}


# ------------------------------- the wrapper -------------------------------
@jax.jit
def feature_embedder_pallas(x, fused):
    """x: (B, L, cat_len + num_dim) float32 -> (B, L, feature_dim) float32."""
    cat_len = len(CAT_COLS)
    uniques = [CAT_UNIQUE[c] for c in CAT_COLS]
    offsets = [int(v) for v in np.cumsum([0] + uniques)[:cat_len]]
    vocab_ext = int(sum(uniques)) + 1                 # +1 bias lane / bias row

    Bx, Lx, Fin = x.shape
    N = Bx * Lx
    x2 = x.reshape(N, Fin)
    x_cat = x2[:, :cat_len]                           # (N, cat_len) lane-aligned small ref
    x_num = x2[:, cat_len:]                           # (N, num_dim)

    # ---- row tiling: as few, as fat tiles as possible; >=2 steps for v7x megacore ----
    # (For tiny N the pallas_call is pure launch overhead; a plain-XLA fallback below a
    #  row-count threshold would be reasonable in production.)
    n_rows = _round_up(N, SUBLANE)
    min_steps = 2 if n_rows >= MEGACORE_MIN_ROWS else 1
    steps = max(-(-n_rows // MAX_TM), min_steps)
    tm = _round_up(-(-n_rows // steps), SUBLANE)
    steps = -(-n_rows // tm)
    Np = steps * tm

    if Np != N:
        # Pad a handful of rows (zeros hit table row 0 + bias; sliced off below).
        pad = Np - N
        x_cat = jnp.concatenate([x_cat, jnp.zeros((pad, cat_len), x_cat.dtype)], axis=0)
        x_num = jnp.concatenate([x_num, jnp.zeros((pad, NUM_DIM), x_num.dtype)], axis=0)

    w_cat_ext = fused["w_cat_ext"]                    # (vocab_ext, F)
    w_num = fused["w_num"]                            # (num_dim, F)

    out = pl.pallas_call(
        make_kernel(cat_len, offsets, vocab_ext),
        out_shape=jax.ShapeDtypeStruct((Np, FEATURE_DIM), jnp.float32),
        grid=(steps,),
        in_specs=[
            pl.BlockSpec((tm, cat_len), lambda i: (i, 0)),
            pl.BlockSpec((tm, NUM_DIM), lambda i: (i, 0)),
            pl.BlockSpec(w_cat_ext.shape, lambda i: (0, 0)),   # resident across grid
            pl.BlockSpec(w_num.shape, lambda i: (0, 0)),       # resident across grid
        ],
        out_specs=pl.BlockSpec((tm, FEATURE_DIM), lambda i: (i, 0)),
        compiler_params=pltpu.CompilerParams(dimension_semantics=("parallel",)),
    )(x_cat, x_num, w_cat_ext, w_num)

    if Np != N:
        out = out[:N]     # only when rows were padded; no-op pass in the common case
    return out.reshape(Bx, Lx, FEATURE_DIM)


# ------------------------- pure-JAX reference (glue) -------------------------
def feature_embedder_ref(x, params):
    cat_len = len(CAT_COLS)
    cat_x = x[..., :cat_len].astype(jnp.int32)
    num_x = x[..., cat_len:]
    embs = [params["emb"][i][cat_x[..., i]] for i in range(len(CAT_COLS))]
    cat_emb = jnp.concatenate(embs, axis=-1)
    num_emb = num_x @ params["w_num"].T + params["b_num"]
    out = jnp.concatenate([cat_emb, num_emb], axis=-1) @ params["w_out"].T + params["b_out"]
    return out


# ------------------------------ parameter init ------------------------------
def init_params(key):
    emb_dims = _emb_dims()
    cat_out_dim = sum(emb_dims)
    keys = jax.random.split(key, len(CAT_COLS) + 4)
    params = {"emb": []}
    for i, c in enumerate(CAT_COLS):
        u = CAT_UNIQUE[c]
        params["emb"].append(jax.random.normal(keys[i], (u, emb_dims[i]), jnp.float32))
    k = len(CAT_COLS)
    bn = 1.0 / np.sqrt(NUM_DIM)
    params["w_num"] = jax.random.uniform(keys[k], (NUM_DIM, NUM_DIM), jnp.float32, -bn, bn)
    params["b_num"] = jax.random.uniform(keys[k + 1], (NUM_DIM,), jnp.float32, -bn, bn)
    bo = 1.0 / np.sqrt(cat_out_dim + NUM_DIM)
    params["w_out"] = jax.random.uniform(
        keys[k + 2], (FEATURE_DIM, cat_out_dim + NUM_DIM), jnp.float32, -bo, bo)
    params["b_out"] = jax.random.uniform(keys[k + 3], (FEATURE_DIM,), jnp.float32, -bo, bo)
    return params


# ----------------------------------- main -----------------------------------
if __name__ == "__main__":
    key = jax.random.PRNGKey(0)
    kp, kc, kn = jax.random.split(key, 3)

    params = init_params(kp)
    fused = fuse_params(params)   # one-time pre-fusion, outside the per-call path

    # x: categorical index columns stored as float (like the PyTorch path that casts
    # with .long()), followed by numeric columns
    cat_len = len(CAT_COLS)
    cat_keys = jax.random.split(kc, cat_len)
    cat_cols = [
        jax.random.randint(cat_keys[i], (B, L, 1), 0, CAT_UNIQUE[c]).astype(jnp.float32)
        for i, c in enumerate(CAT_COLS)
    ]
    num_part = jax.random.normal(kn, (B, L, NUM_DIM), jnp.float32)
    x = jnp.concatenate(cat_cols + [num_part], axis=-1)  # (B, L, cat_len + num_dim)

    out = feature_embedder_pallas(x, fused)
    out = jax.block_until_ready(out)

    ref = jax.block_until_ready(feature_embedder_ref(x, params))
    assert out.shape == (B, L, FEATURE_DIM)
    assert jnp.allclose(out, ref, atol=1e-3, rtol=1e-3), "mismatch vs pure-JAX reference"

    print("KERNEL_OK")
</pallas_src>

<mosaic_0001>
module attributes {stable_mosaic.version = 11 : i64} {
  func.func @kernel(%arg0: i32, %arg1: memref<16x3xf32, #tpu.memory_space<vmem>>, %arg2: memref<16x32xf32, #tpu.memory_space<vmem>>, %arg3: memref<37x64xf32, #tpu.memory_space<vmem>>, %arg4: memref<32x64xf32, #tpu.memory_space<vmem>>, %arg5: memref<16x64xf32, #tpu.memory_space<vmem>>) attributes {dimension_semantics = [#tpu.dimension_semantics<parallel>], iteration_bounds = array<i64: 1>, scalar_prefetch = 0 : i64, scratch_operands = 0 : i64, tpu.core_type = #tpu.core_type<tc>, window_params = [{transform_indices = @transform_0, window_bounds = array<i64: 16, 3>}, {transform_indices = @transform_1, window_bounds = array<i64: 16, 32>}, {pipeline_mode = #tpu.pipeline_mode<synchronous>, transform_indices = @transform_2, window_bounds = array<i64: 37, 64>}, {pipeline_mode = #tpu.pipeline_mode<synchronous>, transform_indices = @transform_3, window_bounds = array<i64: 32, 64>}, {transform_indices = @transform_4, window_bounds = array<i64: 16, 64>}]} {
    %c0 = arith.constant 0 : index
    %c0_0 = arith.constant 0 : index
    %0 = vector.load %arg1[%c0, %c0_0] : memref<16x3xf32, #tpu.memory_space<vmem>>, vector<16x3xf32>
    %c0_1 = arith.constant 0 : index
    %c0_2 = arith.constant 0 : index
    %1 = vector.load %arg2[%c0_1, %c0_2] : memref<16x32xf32, #tpu.memory_space<vmem>>, vector<16x32xf32>
    %2 = tpu.iota {dimensions = array<i32: 1>} : vector<1x37xi32>
    %3 = arith.sitofp %2 : vector<1x37xi32> to vector<1x37xf32>
    %cst = arith.constant 3.600000e+01 : f32
    %4 = vector.broadcast %cst : f32 to vector<1x37xf32>
    %5 = arith.cmpf oeq, %3, %4 : vector<1x37xf32>
    %6 = arith.extui %5 : vector<1x37xi1> to vector<1x37xi32>
    %7 = arith.sitofp %6 : vector<1x37xi32> to vector<1x37xf32>
    %8 = vector.extract_strided_slice %0 {offsets = [0, 0], sizes = [16, 1], strides = [1, 1]} : vector<16x3xf32> to vector<16x1xf32>
    %cst_3 = arith.constant 0.000000e+00 : f32
    %9 = vector.broadcast %cst_3 : f32 to vector<16x1xf32>
    %10 = arith.addf %8, %9 : vector<16x1xf32>
    %11 = vector.broadcast %10 : vector<16x1xf32> to vector<16x37xf32>
    %12 = vector.broadcast %3 : vector<1x37xf32> to vector<16x37xf32>
    %13 = arith.cmpf oeq, %11, %12 : vector<16x37xf32>
    %14 = arith.extui %13 : vector<16x37xi1> to vector<16x37xi32>
    %15 = arith.sitofp %14 : vector<16x37xi32> to vector<16x37xf32>
    %16 = vector.broadcast %7 : vector<1x37xf32> to vector<16x37xf32>
    %17 = arith.addf %16, %15 : vector<16x37xf32>
    %18 = vector.extract_strided_slice %0 {offsets = [0, 1], sizes = [16, 1], strides = [1, 1]} : vector<16x3xf32> to vector<16x1xf32>
    %cst_4 = arith.constant 1.000000e+01 : f32
    %19 = vector.broadcast %cst_4 : f32 to vector<16x1xf32>
    %20 = arith.addf %18, %19 : vector<16x1xf32>
    %21 = vector.broadcast %20 : vector<16x1xf32> to vector<16x37xf32>
    %22 = vector.broadcast %3 : vector<1x37xf32> to vector<16x37xf32>
    %23 = arith.cmpf oeq, %21, %22 : vector<16x37xf32>
    %24 = arith.extui %23 : vector<16x37xi1> to vector<16x37xi32>
    %25 = arith.sitofp %24 : vector<16x37xi32> to vector<16x37xf32>
    %26 = arith.addf %17, %25 : vector<16x37xf32>
    %27 = vector.extract_strided_slice %0 {offsets = [0, 2], sizes = [16, 1], strides = [1, 1]} : vector<16x3xf32> to vector<16x1xf32>
    %cst_5 = arith.constant 1.600000e+01 : f32
    %28 = vector.broadcast %cst_5 : f32 to vector<16x1xf32>
    %29 = arith.addf %27, %28 : vector<16x1xf32>
    %30 = vector.broadcast %29 : vector<16x1xf32> to vector<16x37xf32>
    %31 = vector.broadcast %3 : vector<1x37xf32> to vector<16x37xf32>
    %32 = arith.cmpf oeq, %30, %31 : vector<16x37xf32>
    %33 = arith.extui %32 : vector<16x37xi1> to vector<16x37xi32>
    %34 = arith.sitofp %33 : vector<16x37xi32> to vector<16x37xf32>
    %35 = arith.addf %26, %34 : vector<16x37xf32>
    %c0_6 = arith.constant 0 : index
    %c0_7 = arith.constant 0 : index
    %36 = vector.load %arg3[%c0_6, %c0_7] : memref<37x64xf32, #tpu.memory_space<vmem>>, vector<37x64xf32>
    %cst_8 = arith.constant dense<0.000000e+00> : vector<16x64xf32>
    %37 = tpu.matmul %35, %36, %cst_8 {dimension_numbers = #tpu.dot_dimension_numbers<[1], [0], [0], [1], [0, 0, 1, 1], [], []>} : vector<16x37xf32>, vector<37x64xf32>, vector<16x64xf32> -> vector<16x64xf32>
    %c0_9 = arith.constant 0 : index
    %c0_10 = arith.constant 0 : index
    %38 = vector.load %arg4[%c0_9, %c0_10] : memref<32x64xf32, #tpu.memory_space<vmem>>, vector<32x64xf32>
    %cst_11 = arith.constant dense<0.000000e+00> : vector<16x64xf32>
    %39 = tpu.matmul %1, %38, %cst_11 {dimension_numbers = #tpu.dot_dimension_numbers<[1], [0], [0], [1], [0, 0, 1, 1], [], []>} : vector<16x32xf32>, vector<32x64xf32>, vector<16x64xf32> -> vector<16x64xf32>
    %40 = arith.addf %37, %39 : vector<16x64xf32>
    %c0_12 = arith.constant 0 : index
    %c0_13 = arith.constant 0 : index
    %41 = vector.load %arg5[%c0_12, %c0_13] : memref<16x64xf32, #tpu.memory_space<vmem>>, vector<16x64xf32>
    tpu.vector_store %arg5[%c0_12, %c0_13], %40 {strides = array<i32>} : memref<16x64xf32, #tpu.memory_space<vmem>>, vector<16x64xf32>,
    return
  }
  func.func @transform_0(%arg0: i32) -> (i32, i32) {
    %c0_i32 = arith.constant 0 : i32
    %c0_i32_0 = arith.constant 0 : i32
    return %arg0, %c0_i32 : i32, i32
  }
  func.func @transform_1(%arg0: i32) -> (i32, i32) {
    %c0_i32 = arith.constant 0 : i32
    %c0_i32_0 = arith.constant 0 : i32
    return %arg0, %c0_i32 : i32, i32
  }
  func.func @transform_2(%arg0: i32) -> (i32, i32) {
    %c0_i32 = arith.constant 0 : i32
    %c0_i32_0 = arith.constant 0 : i32
    %c0_i32_1 = arith.constant 0 : i32
    return %c0_i32, %c0_i32_0 : i32, i32
  }
  func.func @transform_3(%arg0: i32) -> (i32, i32) {
    %c0_i32 = arith.constant 0 : i32
    %c0_i32_0 = arith.constant 0 : i32
    %c0_i32_1 = arith.constant 0 : i32
    return %c0_i32, %c0_i32_0 : i32, i32
  }
  func.func @transform_4(%arg0: i32) -> (i32, i32) {
    %c0_i32 = arith.constant 0 : i32
    %c0_i32_0 = arith.constant 0 : i32
    return %arg0, %c0_i32 : i32, i32
  }
}

</mosaic_0001>

<bundles_post_ra>
// kernel: feature_embedder_pallas.1
= control target key start
LH: loop header
LB: loop body
LE: loop exit
PB: predicated region body
PF: predicated region fallthrough
CT: control target
= control target key end

     0   :  { %9 = vsyncpa [#allocation3], 0  ;;  %s395_s0 = inlined_call_operand.vmem [shape: f32[16,3], index: 0, kind: input, shape index: {}]   ;;  %s396_s1 = inlined_call_operand.vmem [shape: f32[16,32], index: 1, kind: input, shape index: {}]   ;;  %s397_s2 = inlined_call_operand.hbm [shape: f32[37,64], index: 2, kind: input, shape index: {}]   ;;  %s398_s3 = inlined_call_operand.hbm [shape: f32[32,64], index: 3, kind: input, shape index: {}]   ;;  %s399_s4 = inlined_call_operand.hbm [shape: f32[16,64], index: 4, kind: output, shape index: {}]  }
   0x1   :  { %10 = vsyncpa [#allocation6], 0 }
   0x2   :  { %11 = vsyncpa [#allocation4], 0  ;;  %s20_s17 = sshll.u32 %s397_s2, 4  ;;  %s331_s18 = smov [#allocation2]   ;;  %s21_s17 = int_to_ptr.hbm [resolvable:$true] %s20_s17 }
   0x3   :  { %s22_s19 = sshll.u32 %s331_s18, 4  ;;  %s33_s22 = sshll.u32 %s398_s3, 4  ;;  %s23_s19 = int_to_ptr.vmem [resolvable:$true] %s22_s19  ;;  %s34_s22 = int_to_ptr.hbm [resolvable:$true] %s33_s22 }
   0x4   :  { %s332_s23 = smov 128   ;;  %s333_s24 = smov 8  }
   0x5   :  { %28 = dma.hbm_to_vmem [thread:$0]  %s21_s17, 640, %s23_s19, [#allocation3], %s332_s23, %s332_s23, %s333_s24  }
   0x6   :  { %s334_s25 = smov [#allocation5]  }
   0x7   :  { %s35_s26 = sshll.u32 %s334_s25, 4  ;;  %s36_s26 = int_to_ptr.vmem [resolvable:$true] %s35_s26 }
   0x8   :  { %41 = dma.hbm_to_vmem [thread:$0]  %s34_s22, 512, %s36_s26, [#allocation6], %s332_s23, %s332_s23, %s333_s24  }
   0x9   :  { %325 = dma.done.wait [#allocation3], 640  }
   0xa   :  { %326 = vsyncadd [#allocation3], 4294966656 }
   0xb   :  { %327 = dma.done.wait [#allocation6], 512  }
   0xc   :  { %328 = vsyncadd [#allocation6], 4294966784  ;;  %v335_v0 = vmov 0   ;;  %v336_v1 = vmov 2   ;;  %v337_v2 = vmov 1   ;;  %v51_v3 = vld [vmem:[%s395_s0 + $0x8] sm:$0xff]  ;;  %v54_v20 = vlaneseq }
   0xd   :  { %246 = vset.pattern.permute.xlu0 %v335_v0  ;;  %248 = vset.pattern.permute.xlu1 %v336_v1  ;;  %v50_v4 = vld [vmem:[%s395_s0] sm:$0xff]  ;;  %v101_v5 = vadd.f32 16.0, %v51_v3  ;;  %v81_v7 = vadd.f32 10.0, %v51_v3  ;;  %vm166_vm0 = vcmask 1044480   ;;  %v123_v11 = vld [vmem:[#allocation2 + $0x18] sm:$0xff]  ;;  %v122_v13 = vld [vmem:[#allocation2 + $0x10] sm:$0xff] }
   0xe   :  { %250 = vset.pattern.permute.xlu2 %v337_v2  ;;  %69 = vperm.xlu0 %246, %v51_v3   ;;  %v80_v6 = vadd.f32 10.0, %v50_v4  ;;  %v100_v8 = vadd.f32 16.0, %v50_v4  ;;  %v124_v9 = vld [vmem:[#allocation2 + $0x20] sm:$0x1f]  ;;  %v127_v12 = vld [vmem:[#allocation5 + $0x10] sm:$0xff]  ;;  %v126_v14 = vld [vmem:[#allocation5 + $0x8] sm:$0xff] }
   0xf   :  { %109 = vperm.xlu1 %248, %v101_v5   ;;  %v128_v10 = vld [vmem:[#allocation5 + $0x18] sm:$0xff]  ;;  %232 = vmatpush.msk.msra.mxu2 %vm166_vm0, %v124_v9  ;;  %v121_v15 = vld [vmem:[#allocation2 + $0x8] sm:$0xff]  ;;  %vm129_vm1 = vcmask 261120   ;;  %v55_v21 = vand.u32 127, %v54_v20  ;;  %v338_v26 = vmov 0.0   ;;  %vm159_vm9 = vcmask 302080  }
  0x10   :  { %84 = vperm.xlu2 %250, %v80_v6   ;;  %228 = vmatpush.msra.mxu3 %v128_v10  ;;  %v125_v16 = vld [vmem:[#allocation5] sm:$0xff]  ;;  %v120_v17 = vld [vmem:[#allocation2] sm:$0xff]  ;;  %vm193_vm10 = vcmask 523264   ;;  %s202_s9 = sshll.u32 %s399_s4, 4  ;;  %s203_s9 = int_to_ptr.hbm [resolvable:$true] %s202_s9 }
  0x11   :  { %225 = vmatpush.msk.msra.mxu1 %vm166_vm0, %v124_v9  ;;  %148 = vmatpush.msra.mxu0 %v128_v10  ;;  %v53_v18 = vld [vmem:[%s396_s1 + $0x8] sm:$0xff]  ;;  %v52_v19 = vld [vmem:[%s396_s1] sm:$0xff]  ;;  %v56_v23 = vcvt.s32.f32 %v55_v21  ;;  %s339_s1 = smov [#allocation7]  }
  0x12   :  { %233 = vmatpush.msra.mxu2 %v123_v11  ;;  %229 = vmatpush.msra.mxu3 %v127_v12  ;;  %s200_s6 = sshll.u32 %s339_s1, 4  ;;  %s201_s6 = int_to_ptr.vmem [resolvable:$true] %s200_s6 }
  0x13   :  { %182 = vmatpush.msra.mxu1 %v123_v11  ;;  %149 = vmatpush.msra.mxu0 %v127_v12  ;;  %vm57_vm2 = vcmp.eq.f32.partialorder %v56_v23, 36.0 }
  0x14   :  { %234 = vmatpush.msra.mxu2 %v122_v13  ;;  %230 = vmatpush.msra.mxu3 %v126_v14  ;;  %v216_v27 = vsel %vm57_vm2, 1.0, %v338_v26 }
  0x15   :  { %183 = vmatpush.msra.mxu1 %v122_v13  ;;  %150 = vmatpush.msra.mxu0 %v126_v14 }
  0x16   :  { %247 = vset.pattern.permute.xlu0 %v337_v2  ;;  %235 = vmatpush.msra.mxu2 %v121_v15 }
  0x17   :  { %89 = vperm.xlu0 %247, %v81_v7   ;;  %249 = vset.pattern.permute.xlu1 %v335_v0 }
  0x18   :  { %251 = vset.pattern.permute.xlu2 %v336_v1  ;;  %64 = vperm.xlu1 %249, %v50_v4  }
  0x19   :  { %104 = vperm.xlu2 %251, %v100_v8   ;;  %184 = vmatpush.msra.mxu1 %v121_v15 }
  0x1a   :  { %231 = vmatpush.msra.mxu3 %v125_v16  ;;  %236 = vmatpush.msra.mxu2 %v120_v17 }
  0x1b   :  { %224 = vmatmul.msk.f32.vlgmr.msra.gmra.mxu3 %vm129_vm1, %v53_v18  ;;  %151 = vmatpush.msra.mxu0 %v125_v16 }
  0x1c   :  { %185 = vmatpush.msra.mxu1 %v120_v17  ;;  %223 = vmatmul.msk.f32.vlgmr.msra.gmra.mxu0 %vm129_vm1, %v52_v19 }
  0x1f   :  { %252 = vset.pattern.permute.xlu0 %v336_v1 }
  0x6a   :  { %v85_v22 = vpop.permute.xlu2 %84 }
  0x6b   :  { %vm92_vm6 = vcmp.eq.f32.partialorder %v85_v22, %v56_v23 }
  0x6c   :  { %v219_v39 = vsel %vm92_vm6, 1.0, %v338_v26 }
  0x73   :  { %v105_v30 = vpop.permute.xlu2 %104 }
  0x74   :  { %vm112_vm8 = vcmp.eq.f32.partialorder %v105_v30, %v56_v23 }
  0x75   :  { %v221_v40 = vsel %vm112_vm8, 1.0, %v338_v26 }
  0x80   :  { %v70_v24 = vpop.permute.xlu0 %69 }
  0x81   :  { %v110_v25 = vpop.permute.xlu1 %109  ;;  %vm73_vm3 = vcmp.eq.f32.partialorder %v70_v24, %v56_v23 }
  0x82   :  { %v218_v28 = vsel %vm73_vm3, 1.0, %v338_v26  ;;  %vm113_vm4 = vcmp.eq.f32.partialorder %v110_v25, %v56_v23 }
  0x83   :  { %v79_v31 = vadd.f32 %v218_v28, %v216_v27  ;;  %v222_v35 = vsel %vm113_vm4, 1.0, %v338_v26 }
  0x89   :  { %v90_v29 = vpop.permute.xlu0 %89 }
  0x8a   :  { %vm93_vm5 = vcmp.eq.f32.partialorder %v90_v29, %v56_v23  ;;  %v65_v33 = vpop.permute.xlu1 %64 }
  0x8b   :  { %v220_v32 = vsel %vm93_vm5, 1.0, %v338_v26  ;;  %vm72_vm7 = vcmp.eq.f32.partialorder %v65_v33, %v56_v23 }
  0x8c   :  { %v99_v34 = vadd.f32 %v220_v32, %v79_v31  ;;  %v217_v36 = vsel %vm72_vm7, 1.0, %v338_v26 }
  0x8d   :  { %v78_v37 = vadd.f32 %v217_v36, %v216_v27 }
  0x8e   :  { %v119_v38 = vadd.f32 %v222_v35, %v99_v34 }
  0x8f   :  { %v98_v41 = vadd.f32 %v219_v39, %v78_v37 }
  0x90   :  { %227 = vmatmul.msk.f32.vlgmr.msra.gmra.mxu2 %vm159_vm9, %v119_v38 }
  0x91   :  { %v118_v42 = vadd.f32 %v221_v40, %v98_v41 }
  0x93   :  { %226 = vmatmul.msk.f32.vlgmr.msra.gmra.mxu1 %vm159_vm9, %v118_v42 }
  0x99   :  { %v153_v43 = vpop.f32.mrf.mxu0 }
  0x9e   :  { %v156_v45 = vpop.f32.mrf.mxu3 }
 0x110   :  { %v187_v44 = vpop.f32.mrf.mxu1 }
 0x111   :  { %v188_v46 = vadd.f32 %v187_v44, %v153_v43 }
 0x113   :  { %v190_v47 = vpop.f32.mrf.mxu2  ;;  %194 = vst.msk [vmem:[#allocation7] sm:$0xff] %vm193_vm10, %v188_v46 }
 0x114   :  { %v191_v48 = vadd.f32 %v190_v47, %v156_v45 }
 0x116   :  { %195 = vst.msk [vmem:[#allocation7 + $0x8] sm:$0xff] %vm193_vm10, %v191_v48 }
 0x117   :  { %208 = dma.vmem_to_hbm [thread:$0]  %s201_s6, 256, %s203_s9, [#allocation4], %s332_s23, %s332_s23, %s333_s24  }
 0x118   :  { %329 = dma.done.wait [#allocation4], 256  }
 0x119   :  { %330 = vsyncadd [#allocation4], 4294967040 }
 0x11a   :  { %213 = vsyncpa [#allocation3], 1 }
 0x11b   :  { %214 = vsyncpa [#allocation6], 1 }
 0x11c   :  { %215 = vsyncpa [#allocation4], 1 }

</bundles_post_ra>
